<compile_context>
chip_gen: v6e
topology: v6e:2x2x1
jax: 0.10.0
libtpu: 0.0.40
codegen_flags: <defaults>
</compile_context>

<pallas_src>
import functools

import jax
import jax.numpy as jnp
from jax.experimental import pallas as pl
from jax.experimental.pallas import tpu as pltpu

_VMEM_LIMIT = 48 * 1024 * 1024  # < v7x 64 MiB/TC physical; ample on v5e/v6e


def _round_up(a, b):
    return (a + b - 1) // b * b


# ---------------------------------------------------------------------------
# Fused single-kernel path: whole (N, C, L) tensor resident in VMEM.
# ---------------------------------------------------------------------------
def _fused_kernel(x_ref, gamma_ref, beta_ref, mw_ref, vw_ref, o_ref, *, hw, eps):
    xf = x_ref[...].astype(jnp.float32)                       # (N, C, L)
    lf = jnp.float32(hw)
    s = jnp.sum(xf, axis=-1, keepdims=True)                   # (N, C, 1)
    sq = jnp.sum(xf * xf, axis=-1, keepdims=True)             # (N, C, 1)

    mean_in = s / lf
    # torch.Tensor.var default: unbiased (L - 1). One-pass form; clamp >= 0
    # against catastrophic cancellation. L == 1 guarded (torch NaNs there).
    var_in = (sq - s * s / lf) / jnp.float32(max(hw - 1, 1))
    var_in = jnp.maximum(var_in, 0.0)
    temp = var_in + mean_in * mean_in

    mean_ln = jnp.mean(mean_in, axis=1, keepdims=True)        # (N, 1, 1)
    var_ln = jnp.mean(temp, axis=1, keepdims=True) - mean_ln * mean_ln
    mean_bn = jnp.mean(mean_in, axis=0, keepdims=True)        # (1, C, 1)
    var_bn = jnp.mean(temp, axis=0, keepdims=True) - mean_bn * mean_bn

    mean = mw_ref[0] * mean_in + mw_ref[1] * mean_ln + mw_ref[2] * mean_bn
    var = vw_ref[0] * var_in + vw_ref[1] * var_ln + vw_ref[2] * var_bn
    var = jnp.maximum(var, 0.0)

    scale = gamma_ref[...] * jax.lax.rsqrt(var + jnp.float32(eps))   # (N, C, 1)
    shift = beta_ref[...] - mean * scale
    o_ref[...] = (xf * scale + shift).astype(o_ref.dtype)


# ---------------------------------------------------------------------------
# Tiled two-pass path.
# ---------------------------------------------------------------------------
def _stats_kernel(x_ref, sum_ref, sq_ref, *, n_lanes, lane_block, ragged):
    """Pass 1: per-row sum(x) and sum(x*x) streamed over L-tiles."""
    @pl.when(pl.program_id(1) == 0)
    def _():
        sum_ref[...] = jnp.zeros_like(sum_ref)
        sq_ref[...] = jnp.zeros_like(sq_ref)

    xf = x_ref[...].astype(jnp.float32)                        # (rb, lb)
    if ragged:
        # Ragged last L-tile: OOB lanes hold unspecified data -> zero them.
        lane = jax.lax.broadcasted_iota(jnp.int32, xf.shape, 1)
        valid = (pl.program_id(1) * lane_block + lane) < n_lanes
        xf = jnp.where(valid, xf, 0.0)
    sum_ref[...] += jnp.sum(xf, axis=-1, keepdims=True)        # (rb, 1)
    sq_ref[...] += jnp.sum(xf * xf, axis=-1, keepdims=True)    # (rb, 1)


def _normalize_kernel(x_ref, scale_ref, shift_ref, o_ref):
    """Pass 2: out = x * scale + shift (per-row scale/shift, single FMA)."""
    xf = x_ref[...].astype(jnp.float32)
    o_ref[...] = (xf * scale_ref[...] + shift_ref[...]).astype(o_ref.dtype)


# ---------------------------------------------------------------------------
# Wrapper.
# ---------------------------------------------------------------------------
@functools.partial(
    jax.jit,
    static_argnames=("eps", "row_block", "lane_block", "max_fused_bytes"))
def switch_norm(x, weight, bias, mean_weight, var_weight, eps=1e-5,
                row_block=512, lane_block=2048,
                max_fused_bytes=16 * 1024 * 1024):
    """Pallas SwitchNorm forward (training mode, using_bn=True).

    x: (N, C, H, W) NCHW (any float dtype); weight/bias: (1, C, 1, 1);
    mean_weight/var_weight: (3,) switch logits.
    """
    N, C, H, W = x.shape
    L = H * W
    R = N * C
    itemsize = x.dtype.itemsize

    mw = jax.nn.softmax(mean_weight.astype(jnp.float32), axis=0)   # (3,)
    vw = jax.nn.softmax(var_weight.astype(jnp.float32), axis=0)    # (3,)

    # ---- fused fast path: whole tensor fits in VMEM -----------------------
    # Rough footprint: input + output + f32 working copy + one f32 temp.
    fused_bytes = R * L * (2 * itemsize + 8)
    if fused_bytes <= max_fused_bytes:
        x3 = x.reshape(N, C, L)
        gamma = weight.reshape(1, C, 1).astype(jnp.float32)
        beta = bias.reshape(1, C, 1).astype(jnp.float32)
        out3 = pl.pallas_call(
            functools.partial(_fused_kernel, hw=L, eps=eps),
            out_shape=jax.ShapeDtypeStruct((N, C, L), x.dtype),
            in_specs=[
                pl.BlockSpec(memory_space=pltpu.MemorySpace.VMEM),   # x
                pl.BlockSpec(memory_space=pltpu.MemorySpace.VMEM),   # gamma
                pl.BlockSpec(memory_space=pltpu.MemorySpace.VMEM),   # beta
                pl.BlockSpec(memory_space=pltpu.MemorySpace.SMEM),   # mw
                pl.BlockSpec(memory_space=pltpu.MemorySpace.SMEM),   # vw
            ],
            out_specs=pl.BlockSpec(memory_space=pltpu.MemorySpace.VMEM),
            compiler_params=pltpu.CompilerParams(vmem_limit_bytes=_VMEM_LIMIT),
        )(x3, gamma, beta, mw, vw)
        return out3.reshape(N, C, H, W)

    # ---- tiled two-pass path ----------------------------------------------
    x2 = x.reshape(R, L)                                      # native dtype, no pad

    # Block sizes: round only to the hardware tile (8 * packing, 128); ragged
    # edges handled by the grid / in-kernel masks (no zero traffic).
    sub = 8 * max(1, 4 // itemsize)                           # 8 f32 / 16 bf16 / 32 i8
    rb = min(row_block, _round_up(R, sub))
    if pl.cdiv(R, rb) < 2 and R > sub:
        rb = _round_up(pl.cdiv(R, 2), sub)                    # >=2 row blocks (v7x 2 TCs)
    lb = min(lane_block, _round_up(L, 128))
    grid = (pl.cdiv(R, rb), pl.cdiv(L, lb))
    ragged_l = (L % lb) != 0

    cparams_stats = pltpu.CompilerParams(
        dimension_semantics=("parallel", "arbitrary"),
        vmem_limit_bytes=_VMEM_LIMIT)
    cparams_norm = pltpu.CompilerParams(
        dimension_semantics=("parallel", "parallel"),
        vmem_limit_bytes=_VMEM_LIMIT)

    # ---- pass 1: streamed per-(n, c) moments -------------------------------
    sum_x, sum_x2 = pl.pallas_call(
        functools.partial(_stats_kernel, n_lanes=L, lane_block=lb, ragged=ragged_l),
        out_shape=(jax.ShapeDtypeStruct((R, 1), jnp.float32),
                   jax.ShapeDtypeStruct((R, 1), jnp.float32)),
        grid=grid,
        in_specs=[pl.BlockSpec((rb, lb), lambda r, l: (r, l))],
        out_specs=(pl.BlockSpec((rb, 1), lambda r, l: (r, 0)),
                   pl.BlockSpec((rb, 1), lambda r, l: (r, 0))),
        compiler_params=cparams_stats,
    )(x2)

    # ---- tiny (N, C) combine (fused by XLA under jit) ----------------------
    sum_x = sum_x[:, 0].reshape(N, C)
    sum_x2 = sum_x2[:, 0].reshape(N, C)

    Lf = jnp.float32(L)
    mean_in = sum_x / Lf
    var_in = (sum_x2 - sum_x * sum_x / Lf) / jnp.float32(max(L - 1, 1))
    var_in = jnp.maximum(var_in, 0.0)
    temp = var_in + mean_in * mean_in

    mean_ln = jnp.mean(mean_in, axis=1, keepdims=True)            # (N, 1)
    var_ln = jnp.mean(temp, axis=1, keepdims=True) - mean_ln * mean_ln
    mean_bn = jnp.mean(mean_in, axis=0, keepdims=True)            # (1, C)
    var_bn = jnp.mean(temp, axis=0, keepdims=True) - mean_bn * mean_bn

    mean = mw[0] * mean_in + mw[1] * mean_ln + mw[2] * mean_bn    # (N, C)
    var = jnp.maximum(vw[0] * var_in + vw[1] * var_ln + vw[2] * var_bn, 0.0)

    gamma = weight.reshape(1, C).astype(jnp.float32)
    beta = bias.reshape(1, C).astype(jnp.float32)
    scale = gamma * jax.lax.rsqrt(var + jnp.float32(eps))         # (N, C)
    shift = beta - mean * scale
    scale = scale.reshape(R, 1)
    shift = shift.reshape(R, 1)

    # ---- pass 2: fully tiled normalize (fused scale/shift) -----------------
    out2 = pl.pallas_call(
        _normalize_kernel,
        out_shape=jax.ShapeDtypeStruct((R, L), x.dtype),
        grid=grid,
        in_specs=[pl.BlockSpec((rb, lb), lambda r, l: (r, l)),
                  pl.BlockSpec((rb, 1), lambda r, l: (r, 0)),
                  pl.BlockSpec((rb, 1), lambda r, l: (r, 0))],
        out_specs=pl.BlockSpec((rb, lb), lambda r, l: (r, l)),
        compiler_params=cparams_norm,
    )(x2, scale, shift)

    return out2.reshape(N, C, H, W)


# ---------------------------------------------------------------------------
# Pure-JAX reference + test harness.
# ---------------------------------------------------------------------------
def switch_norm_ref(x, weight, bias, mean_weight, var_weight, eps=1e-5):
    """Pure-JAX reference mirroring the PyTorch forward (training, using_bn)."""
    N, C, H, W = x.shape
    x3 = x.reshape(N, C, -1).astype(jnp.float32)
    mean_in = x3.mean(-1, keepdims=True)
    var_in = x3.var(-1, keepdims=True, ddof=1)        # torch default: unbiased
    mean_ln = mean_in.mean(1, keepdims=True)
    temp = var_in + mean_in ** 2
    var_ln = temp.mean(1, keepdims=True) - mean_ln ** 2
    mean_bn = mean_in.mean(0, keepdims=True)
    var_bn = temp.mean(0, keepdims=True) - mean_bn ** 2
    mw = jax.nn.softmax(mean_weight, axis=0)
    vw = jax.nn.softmax(var_weight, axis=0)
    mean = mw[0] * mean_in + mw[1] * mean_ln + mw[2] * mean_bn
    var = vw[0] * var_in + vw[1] * var_ln + vw[2] * var_bn
    xn = (x3 - mean) / jnp.sqrt(var + eps)
    xn = xn.reshape(N, C, H, W)
    return (xn * weight + bias).astype(x.dtype)


def _make_params(key, C):
    k_g, k_b, k_mw, k_vw = jax.random.split(key, 4)
    weight = jnp.ones((1, C, 1, 1), jnp.float32) + 0.1 * jax.random.normal(k_g, (1, C, 1, 1))
    bias = 0.05 * jax.random.normal(k_b, (1, C, 1, 1), dtype=jnp.float32)
    mean_weight = jnp.ones((3,), jnp.float32) + 0.3 * jax.random.normal(k_mw, (3,))
    var_weight = jnp.ones((3,), jnp.float32) + 0.3 * jax.random.normal(k_vw, (3,))
    return weight, bias, mean_weight, var_weight


if __name__ == "__main__":
    key = jax.random.PRNGKey(0)

    # (name, shape, kwargs) — fused-path cases plus forced-tiled coverage of
    # ragged row / lane blocks and multi-L-tile accumulation.
    cases = [
        ("primary_fused", (2, 4, 16, 16), {}),
        ("ragged_fused", (2, 3, 10, 10), {}),
        ("multi_tile_fused", (2, 8, 64, 32), {}),
        ("tiled_ragged_lanes", (2, 8, 56, 56), {"max_fused_bytes": 0}),
        ("tiled_ragged_rows", (3, 5, 40, 40), {"max_fused_bytes": 0}),
    ]

    for i, (name, (N, C, H, W), kwargs) in enumerate(cases):
        k_case = jax.random.fold_in(key, i)
        k_x, k_p = jax.random.split(k_case)
        x = jax.random.normal(k_x, (N, C, H, W), dtype=jnp.float32) * 2.0 + 0.5
        weight, bias, mean_weight, var_weight = _make_params(k_p, C)

        out = switch_norm(x, weight, bias, mean_weight, var_weight, **kwargs)
        out = jax.block_until_ready(out)
        ref = switch_norm_ref(x, weight, bias, mean_weight, var_weight)

        assert out.shape == (N, C, H, W)
        err = jnp.max(jnp.abs(out - ref))
        assert jnp.allclose(out, ref, atol=2e-4, rtol=2e-4), (
            f"{name}: max abs err = {err}"
        )

    print("KERNEL_OK")
</pallas_src>

<mosaic_0001>
module attributes {stable_mosaic.version = 11 : i64} {
  func.func @_fused_kernel(%arg0: memref<2x4x256xf32, #tpu.memory_space<vmem>>, %arg1: memref<1x4x1xf32, #tpu.memory_space<vmem>>, %arg2: memref<1x4x1xf32, #tpu.memory_space<vmem>>, %arg3: memref<3xf32, #tpu.memory_space<smem>>, %arg4: memref<3xf32, #tpu.memory_space<smem>>, %arg5: memref<2x4x256xf32, #tpu.memory_space<vmem>>) attributes {dimension_semantics = [], scalar_prefetch = 0 : i64, scratch_operands = 0 : i64, tpu.core_type = #tpu.core_type<tc>} {
    %c0 = arith.constant 0 : index
    %c0_0 = arith.constant 0 : index
    %c0_1 = arith.constant 0 : index
    %0 = vector.load %arg0[%c0, %c0_0, %c0_1] : memref<2x4x256xf32, #tpu.memory_space<vmem>>, vector<2x4x256xf32>
    %cst = arith.constant dense<0.000000e+00> : vector<2x4xf32>
    %1 = vector.multi_reduction <add>, %0, %cst [2] : vector<2x4x256xf32> to vector<2x4xf32>
    %2 = vector.shape_cast %1 : vector<2x4xf32> to vector<2x4x1xf32>
    %3 = arith.mulf %0, %0 : vector<2x4x256xf32>
    %cst_2 = arith.constant dense<0.000000e+00> : vector<2x4xf32>
    %4 = vector.multi_reduction <add>, %3, %cst_2 [2] : vector<2x4x256xf32> to vector<2x4xf32>
    %5 = vector.shape_cast %4 : vector<2x4xf32> to vector<2x4x1xf32>
    %cst_3 = arith.constant 2.560000e+02 : f32
    %6 = vector.broadcast %cst_3 : f32 to vector<2x4x1xf32>
    %7 = arith.divf %2, %6 : vector<2x4x1xf32>
    %8 = arith.mulf %2, %2 : vector<2x4x1xf32>
    %cst_4 = arith.constant 2.560000e+02 : f32
    %9 = vector.broadcast %cst_4 : f32 to vector<2x4x1xf32>
    %10 = arith.divf %8, %9 : vector<2x4x1xf32>
    %11 = arith.subf %5, %10 : vector<2x4x1xf32>
    %cst_5 = arith.constant 2.550000e+02 : f32
    %12 = vector.broadcast %cst_5 : f32 to vector<2x4x1xf32>
    %13 = arith.divf %11, %12 : vector<2x4x1xf32>
    %cst_6 = arith.constant 0.000000e+00 : f32
    %14 = vector.broadcast %cst_6 : f32 to vector<2x4x1xf32>
    %15 = arith.maximumf %13, %14 : vector<2x4x1xf32>
    %16 = arith.mulf %7, %7 : vector<2x4x1xf32>
    %17 = arith.addf %15, %16 : vector<2x4x1xf32>
    %cst_7 = arith.constant dense<0.000000e+00> : vector<2x1xf32>
    %18 = vector.multi_reduction <add>, %7, %cst_7 [1] : vector<2x4x1xf32> to vector<2x1xf32>
    %19 = vector.shape_cast %18 : vector<2x1xf32> to vector<2x1x1xf32>
    %cst_8 = arith.constant 4.000000e+00 : f32
    %20 = vector.broadcast %cst_8 : f32 to vector<2x1x1xf32>
    %21 = arith.divf %19, %20 : vector<2x1x1xf32>
    %cst_9 = arith.constant dense<0.000000e+00> : vector<2x1xf32>
    %22 = vector.multi_reduction <add>, %17, %cst_9 [1] : vector<2x4x1xf32> to vector<2x1xf32>
    %23 = vector.shape_cast %22 : vector<2x1xf32> to vector<2x1x1xf32>
    %cst_10 = arith.constant 4.000000e+00 : f32
    %24 = vector.broadcast %cst_10 : f32 to vector<2x1x1xf32>
    %25 = arith.divf %23, %24 : vector<2x1x1xf32>
    %26 = arith.mulf %21, %21 : vector<2x1x1xf32>
    %27 = arith.subf %25, %26 : vector<2x1x1xf32>
    %cst_11 = arith.constant dense<0.000000e+00> : vector<4x1xf32>
    %28 = vector.multi_reduction <add>, %7, %cst_11 [0] : vector<2x4x1xf32> to vector<4x1xf32>
    %29 = vector.shape_cast %28 : vector<4x1xf32> to vector<1x4x1xf32>
    %cst_12 = arith.constant 2.000000e+00 : f32
    %30 = vector.broadcast %cst_12 : f32 to vector<1x4x1xf32>
    %31 = arith.divf %29, %30 : vector<1x4x1xf32>
    %cst_13 = arith.constant dense<0.000000e+00> : vector<4x1xf32>
    %32 = vector.multi_reduction <add>, %17, %cst_13 [0] : vector<2x4x1xf32> to vector<4x1xf32>
    %33 = vector.shape_cast %32 : vector<4x1xf32> to vector<1x4x1xf32>
    %cst_14 = arith.constant 2.000000e+00 : f32
    %34 = vector.broadcast %cst_14 : f32 to vector<1x4x1xf32>
    %35 = arith.divf %33, %34 : vector<1x4x1xf32>
    %36 = arith.mulf %31, %31 : vector<1x4x1xf32>
    %37 = arith.subf %35, %36 : vector<1x4x1xf32>
    %c0_15 = arith.constant 0 : index
    %38 = memref.load %arg3[%c0_15] : memref<3xf32, #tpu.memory_space<smem>>
    %39 = vector.broadcast %38 : f32 to vector<2x4x1xf32>
    %40 = arith.mulf %39, %7 : vector<2x4x1xf32>
    %c1 = arith.constant 1 : index
    %41 = memref.load %arg3[%c1] : memref<3xf32, #tpu.memory_space<smem>>
    %42 = vector.broadcast %41 : f32 to vector<2x1x1xf32>
    %43 = arith.mulf %42, %21 : vector<2x1x1xf32>
    %44 = vector.broadcast %43 : vector<2x1x1xf32> to vector<2x4x1xf32>
    %45 = arith.addf %40, %44 : vector<2x4x1xf32>
    %c2 = arith.constant 2 : index
    %46 = memref.load %arg3[%c2] : memref<3xf32, #tpu.memory_space<smem>>
    %47 = vector.broadcast %46 : f32 to vector<1x4x1xf32>
    %48 = arith.mulf %47, %31 : vector<1x4x1xf32>
    %49 = vector.broadcast %48 : vector<1x4x1xf32> to vector<2x4x1xf32>
    %50 = arith.addf %45, %49 : vector<2x4x1xf32>
    %c0_16 = arith.constant 0 : index
    %51 = memref.load %arg4[%c0_16] : memref<3xf32, #tpu.memory_space<smem>>
    %52 = vector.broadcast %51 : f32 to vector<2x4x1xf32>
    %53 = arith.mulf %52, %15 : vector<2x4x1xf32>
    %c1_17 = arith.constant 1 : index
    %54 = memref.load %arg4[%c1_17] : memref<3xf32, #tpu.memory_space<smem>>
    %55 = vector.broadcast %54 : f32 to vector<2x1x1xf32>
    %56 = arith.mulf %55, %27 : vector<2x1x1xf32>
    %57 = vector.broadcast %56 : vector<2x1x1xf32> to vector<2x4x1xf32>
    %58 = arith.addf %53, %57 : vector<2x4x1xf32>
    %c2_18 = arith.constant 2 : index
    %59 = memref.load %arg4[%c2_18] : memref<3xf32, #tpu.memory_space<smem>>
    %60 = vector.broadcast %59 : f32 to vector<1x4x1xf32>
    %61 = arith.mulf %60, %37 : vector<1x4x1xf32>
    %62 = vector.broadcast %61 : vector<1x4x1xf32> to vector<2x4x1xf32>
    %63 = arith.addf %58, %62 : vector<2x4x1xf32>
    %cst_19 = arith.constant 0.000000e+00 : f32
    %64 = vector.broadcast %cst_19 : f32 to vector<2x4x1xf32>
    %65 = arith.maximumf %63, %64 : vector<2x4x1xf32>
    %c0_20 = arith.constant 0 : index
    %c0_21 = arith.constant 0 : index
    %c0_22 = arith.constant 0 : index
    %66 = vector.load %arg1[%c0_20, %c0_21, %c0_22] : memref<1x4x1xf32, #tpu.memory_space<vmem>>, vector<1x4x1xf32>
    %cst_23 = arith.constant 9.99999974E-6 : f32
    %67 = vector.broadcast %cst_23 : f32 to vector<2x4x1xf32>
    %68 = arith.addf %65, %67 : vector<2x4x1xf32>
    %69 = math.rsqrt %68 : vector<2x4x1xf32>
    %70 = vector.broadcast %66 : vector<1x4x1xf32> to vector<2x4x1xf32>
    %71 = arith.mulf %70, %69 : vector<2x4x1xf32>
    %c0_24 = arith.constant 0 : index
    %c0_25 = arith.constant 0 : index
    %c0_26 = arith.constant 0 : index
    %72 = vector.load %arg2[%c0_24, %c0_25, %c0_26] : memref<1x4x1xf32, #tpu.memory_space<vmem>>, vector<1x4x1xf32>
    %73 = arith.mulf %50, %71 : vector<2x4x1xf32>
    %74 = vector.broadcast %72 : vector<1x4x1xf32> to vector<2x4x1xf32>
    %75 = arith.subf %74, %73 : vector<2x4x1xf32>
    %76 = vector.broadcast %71 : vector<2x4x1xf32> to vector<2x4x256xf32>
    %77 = arith.mulf %0, %76 : vector<2x4x256xf32>
    %78 = vector.broadcast %75 : vector<2x4x1xf32> to vector<2x4x256xf32>
    %79 = arith.addf %77, %78 : vector<2x4x256xf32>
    %c0_27 = arith.constant 0 : index
    %c0_28 = arith.constant 0 : index
    %c0_29 = arith.constant 0 : index
    %80 = vector.load %arg5[%c0_27, %c0_28, %c0_29] : memref<2x4x256xf32, #tpu.memory_space<vmem>>, vector<2x4x256xf32>
    tpu.vector_store %arg5[%c0_27, %c0_28, %c0_29], %79 {strides = array<i32>} : memref<2x4x256xf32, #tpu.memory_space<vmem>>, vector<2x4x256xf32>,
    return
  }
}

</mosaic_0001>

<bundles_post_ra>
// kernel: switch_norm.1
= control target key start
LH: loop header
LB: loop body
LE: loop exit
PB: predicated region body
PF: predicated region fallthrough
CT: control target
= control target key end

     0   :  { %10 = vsyncpa [#allocation3], 0  ;;  %s396_s0 = inlined_call_operand.vmem [shape: f32[2,4,256], index: 0, kind: input, shape index: {}]   ;;  %s397_s1 = inlined_call_operand.vmem [shape: f32[1,4,1], index: 1, kind: input, shape index: {}]   ;;  %s398_s2 = inlined_call_operand.vmem [shape: f32[1,4,1], index: 2, kind: input, shape index: {}]   ;;  %s399_s3 = inlined_call_operand.vmem [shape: f32[3], index: 3, kind: input, shape index: {}]   ;;  %s400_s4 = inlined_call_operand.vmem [shape: f32[3], index: 4, kind: input, shape index: {}]   ;;  %s401_s5 = inlined_call_operand.vmem [shape: f32[2,4,256], index: 5, kind: output, shape index: {}]  }
   0x1   :  { %s24_s20 = sshll.u32 %s399_s3, 4  ;;  %s25_s20 = int_to_ptr.vmem [resolvable:$true] %s24_s20 }
   0x2   :  { %11 = vsyncpa [#allocation5], 0  ;;  %s34_s23 = sshll.u32 %s400_s4, 4  ;;  %s264_s24 = scalar_lea.vmem %s25_s20, 16  ;;  %s35_s23 = int_to_ptr.vmem [resolvable:$true] %s34_s23 }
   0x3   :  { %p265_p0 = scmp.ne.s32.totalorder %s25_s20, %s264_s24  ;;  %p269_p1 = scmp.lt.s32.totalorder %s25_s20, %s25_s20 }
   0x4   :  { %p270_p2 = scmp.lt.s32.totalorder %s264_s24, %s264_s24 }
   0x6   :  { %p271_p3 = por %p270_p2, %p269_p1 }
   0x8   :  { %p272_p4 = pnand %p271_p3, %p265_p0 }
   0xa   :  { %275 = shalt.err (!%p272_p4)
}
   0xb   :  { %s292_s25 = smov [#allocation2]   ;;  %s276_s26 = scalar_lea.vmem %s35_s23, 16 }
   0xc   :  { %27 = dma.vmem_to_smem %s25_s20, 16, %s292_s25, [#allocation3]  }
   0xd   :  { %p277_p5 = scmp.ne.s32.totalorder %s35_s23, %s276_s26  ;;  %p281_p6 = scmp.lt.s32.totalorder %s35_s23, %s35_s23 }
   0xe   :  { %p282_p7 = scmp.lt.s32.totalorder %s276_s26, %s276_s26 }
  0x10   :  { %p283_p8 = por %p282_p7, %p281_p6 }
  0x12   :  { %p284_p9 = pnand %p283_p8, %p277_p5 }
  0x14   :  { %287 = shalt.err (!%p284_p9)
}
  0x15   :  { %s293_s3 = smov [#allocation4]  }
  0x16   :  { %37 = dma.vmem_to_smem %s35_s23, 16, %s293_s3, [#allocation5]  }
  0x17   :  { %288 = dma.done.wait [#allocation3], 16  }
  0x18   :  { %289 = vsyncadd [#allocation3], 4294967280 }
  0x19   :  { %290 = dma.done.wait [#allocation5], 16  }
  0x1a   :  { %291 = vsyncadd [#allocation5], 4294967280 }
  0x1b   :  { %44 = sfence }
  0x1c   :  { %v335_v0 = vld [vmem:[%s396_s0] sm:$0xff]  ;;  %vm53_vm0 = vcmask 1043456   ;;  %v340_v1 = vld [vmem:[%s396_s0 + $0x8] sm:$0xff]  ;;  %v294_v20 = vmov 0   ;;  %s374_s0 = sld [smem:[#allocation4]] }
  0x1d   :  { %v49_v2 = vcombine.high %v335_v0, %v335_v0  ;;  %v54_v3 = vsel %vm53_vm0, %v335_v0, 0.0  ;;  %v64_v4 = vmul.f32 %v335_v0, %v335_v0  ;;  %v50_v5 = vcombine.high %v340_v1, %v340_v1  ;;  %256 = vset.pattern.permute.xlu0 %v294_v20  ;;  %257 = vset.pattern.permute.xlu1 %v294_v20  ;;  %s376_s30 = sld [smem:[#allocation4 + $0x1]] }
  0x1e   :  { %v59_v6 = vsel %vm53_vm0, %v340_v1, 0.0  ;;  %v65_v7 = vmul.f32 %v340_v1, %v340_v1  ;;  %s251_s6 = sld [smem:[#allocation4 + $0x2]] }
  0x1f   :  { %v55_v8 = vsel %vm53_vm0, %v49_v2, 0.0  ;;  %v68_v9 = vcombine.high %v64_v4, %v64_v4  ;;  %v72_v10 = vsel %vm53_vm0, %v64_v4, 0.0  ;;  %v60_v11 = vsel %vm53_vm0, %v50_v5, 0.0  ;;  %s248_s7 = sld [smem:[#allocation2 + $0x1]] }
  0x20   :  { %v56_v12 = vadd.f32 %v55_v8, %v54_v3  ;;  %v69_v13 = vcombine.high %v65_v7, %v65_v7  ;;  %v77_v15 = vsel %vm53_vm0, %v65_v7, 0.0  ;;  %v61_v17 = vadd.f32 %v60_v11, %v59_v6  ;;  %s144_s8 = sld [smem:[#allocation2]] }
  0x21   :  { %v73_v14 = vsel %vm53_vm0, %v68_v9, 0.0  ;;  %s249_s9 = sld [smem:[#allocation2 + $0x2]] }
  0x22   :  { %57 = vadd.xlane.f32.xlu0 %v56_v12  ;;  %v74_v16 = vadd.f32 %v73_v14, %v72_v10  ;;  %v78_v18 = vsel %vm53_vm0, %v69_v13, 0.0  ;;  %v160_v13 = vstv %s374_s0 }
  0x23   :  { %v79_v19 = vadd.f32 %v78_v18, %v77_v15  ;;  %v164_v14 = vstv %s376_s30 }
  0x24   :  { %75 = vadd.xlane.f32.xlu1 %v74_v16 }
  0x26   :  { %62 = vadd.xlane.f32.xlu0 %v61_v17 }
  0x28   :  { %80 = vadd.xlane.f32.xlu1 %v79_v19  ;;  %v170_v19 = vstv %s251_s6 }
  0xab   :  { %v58_v21 = vpop.xlane.xlu0 %57 }
  0xac   :  { %v360_v22 = vmul.f32 0.00390625, %v58_v21  ;;  %v85_v23 = vmul.f32 %v58_v21, %v58_v21 }
  0xad   :  { %v76_v24 = vpop.xlane.xlu1 %75 }
  0xae   :  { %v87_v25 = vmul.f32 0.00390625, %v85_v23  ;;  %v100_v26 = vsel %vm53_vm0, %v360_v22, 0.0  ;;  %v96_v40 = vmul.f32 %v360_v22, %v360_v22 }
  0xaf   :  { %v101_v27 = vrot.slane %v100_v26, 4  ;;  %v63_v28 = vpop.xlane.xlu0 %62 }
  0xb0   :  { %v89_v29 = vsub.f32 %v76_v24, %v87_v25  ;;  %v364_v30 = vmul.f32 0.00390625, %v63_v28  ;;  %v86_v31 = vmul.f32 %v63_v28, %v63_v28 }
  0xb1   :  { %v102_v32 = vadd.f32 %v101_v27, %v100_v26  ;;  %v81_v33 = vpop.xlane.xlu1 %80 }
  0xb2   :  { %v92_v34 = vmul.f32 0.003921569, %v89_v29  ;;  %v88_v35 = vmul.f32 0.00390625, %v86_v31  ;;  %v107_v36 = vsel %vm53_vm0, %v364_v30, 0.0  ;;  %v97_v49 = vmul.f32 %v364_v30, %v364_v30 }
  0xb3   :  { %v103_v37 = vrot.slane %v102_v32, 2  ;;  %v108_v38 = vrot.slane %v107_v36, 4  ;;  %v137_v58 = vadd.f32 %v107_v36, %v100_v26 }
  0xb4   :  { %v94_v39 = vmax.f32 %v92_v34, 0.0  ;;  %v90_v41 = vsub.f32 %v81_v33, %v88_v35 }
  0xb5   :  { %v104_v42 = vadd.f32 %v103_v37, %v102_v32  ;;  %v109_v43 = vadd.f32 %v108_v38, %v107_v36  ;;  %v139_v4 = vmul.f32 0.5, %v137_v58 }
  0xb6   :  { %v98_v44 = vadd.f32 %v96_v40, %v94_v39  ;;  %v93_v45 = vmul.f32 0.003921569, %v90_v41  ;;  %v161_v21 = vmul.f32 %v160_v13, %v94_v39  ;;  %v149_v39 = vstv %s248_s7 }
  0xb7   :  { %v110_v46 = vrot.slane %v109_v43, 2  ;;  %v105_v50 = vrot.slane %v104_v42, 1  ;;  %v142_v12 = vmul.f32 %v139_v4, %v139_v4  ;;  %v145_v40 = vstv %s144_s8 }
  0xb8   :  { %v117_v47 = vsel %vm53_vm0, %v98_v44, 0.0  ;;  %v95_v48 = vmax.f32 %v93_v45, 0.0  ;;  %v155_v44 = vstv %s249_s9 }
  0xb9   :  { %v118_v51 = vrot.slane %v117_v47, 4  ;;  %v111_v52 = vadd.f32 %v110_v46, %v109_v43  ;;  %v106_v56 = vadd.f32 %v105_v50, %v104_v42  ;;  %v146_v42 = vmul.f32 %v145_v40, %v360_v22  ;;  %v176_v43 = vld [vmem:[%s397_s1] sm:$0xf] }
  0xba   :  { %v99_v53 = vadd.f32 %v97_v49, %v95_v48  ;;  %v162_v31 = vmul.f32 %v160_v13, %v95_v48  ;;  %v147_v49 = vmul.f32 %v145_v40, %v364_v30  ;;  %v156_v50 = vmul.f32 %v155_v44, %v139_v4  ;;  %v183_v22 = vld [vmem:[%s398_s2] sm:$0xf] }
  0xbb   :  { %v119_v54 = vadd.f32 %v118_v51, %v117_v47  ;;  %v112_v59 = vrot.slane %v111_v52, 1  ;;  %v115_v2 = vmul.f32 0.25, %v106_v56 }
  0xbc   :  { %v124_v55 = vsel %vm53_vm0, %v99_v53, 0.0 }
  0xbd   :  { %v120_v57 = vrot.slane %v119_v54, 2  ;;  %v125_v60 = vrot.slane %v124_v55, 4  ;;  %v140_v62 = vadd.f32 %v124_v55, %v117_v47  ;;  %v113_v5 = vadd.f32 %v112_v59, %v111_v52 }
  0xbe   :  { %v133_v11 = vmul.f32 %v115_v2, %v115_v2  ;;  %v150_v41 = vmul.f32 %v149_v39, %v115_v2 }
  0xbf   :  { %v121_v61 = vadd.f32 %v120_v57, %v119_v54  ;;  %v126_v63 = vadd.f32 %v125_v60, %v124_v55  ;;  %v141_v8 = vmul.f32 0.5, %v140_v62  ;;  %v116_v15 = vmul.f32 0.25, %v113_v5 }
  0xc0   :  { %v152_v46 = vadd.f32 %v150_v41, %v146_v42  ;;  %v295_v60 = vmov 839922192  }
  0xc1   :  { %v122_v3 = vrot.slane %v121_v61, 1  ;;  %v127_v6 = vrot.slane %v126_v63, 2  ;;  %v143_v18 = vsub.f32 %v141_v8, %v142_v12  ;;  %v134_v25 = vmul.f32 %v116_v15, %v116_v15 }
  0xc2   :  { %v151_v47 = vmul.f32 %v149_v39, %v116_v15  ;;  %v157_v52 = vadd.f32 %v156_v50, %v152_v46  ;;  %v197_v30 = vunpack.c.l.s4 %v295_v60 }
  0xc3   :  { %v123_v7 = vadd.f32 %v122_v3, %v121_v61  ;;  %v128_v9 = vadd.f32 %v127_v6, %v126_v63  ;;  %v171_v27 = vmul.f32 %v170_v19, %v143_v18  ;;  %v199_v61 = vlaneseq }
  0xc4   :  { %v153_v51 = vadd.f32 %v151_v47, %v147_v49  ;;  %v198_v62 = vunpack.c.0.s8 %v197_v30 }
  0xc5   :  { %v131_v10 = vmul.f32 0.25, %v123_v7  ;;  %v129_v16 = vrot.slane %v128_v9, 1  ;;  %v200_v63 = vshrl.u32 %v199_v61, 7 }
  0xc6   :  { %v158_v56 = vadd.f32 %v156_v50, %v153_v51 }
  0xc7   :  { %v135_v17 = vsub.f32 %v131_v10, %v133_v11  ;;  %v130_v20 = vadd.f32 %v129_v16, %v128_v9  ;;  %v201_v2 = vsub.s32 %v198_v62, %v200_v63 }
  0xc9   :  { %v165_v23 = vmul.f32 %v164_v14, %v135_v17  ;;  %v132_v24 = vmul.f32 0.25, %v130_v20 }
  0xcb   :  { %v167_v26 = vadd.f32 %v165_v23, %v161_v21  ;;  %v136_v28 = vsub.f32 %v132_v24, %v134_v25 }
  0xcd   :  { %v172_v29 = vadd.f32 %v171_v27, %v167_v26  ;;  %v166_v32 = vmul.f32 %v164_v14, %v136_v28 }
  0xcf   :  { %v174_v33 = vmax.f32 %v172_v29, 0.0  ;;  %v168_v34 = vadd.f32 %v166_v32, %v162_v31 }
  0xd1   :  { %v177_v35 = vadd.f32 1e-05, %v174_v33  ;;  %v173_v36 = vadd.f32 %v171_v27, %v168_v34 }
  0xd3   :  { %260 = vrsqrt.f32 %v177_v35  ;;  %v175_v37 = vmax.f32 %v173_v36, 0.0 }
  0xd5   :  { %v178_v38 = vadd.f32 1e-05, %v175_v37 }
  0xd7   :  { %262 = vrsqrt.f32 %v178_v38 }
  0xe0   :  { %v261_v45 = vpop.eup %260 }
  0xe1   :  { %v181_v48 = vmul.f32 %v261_v45, %v176_v43 }
  0xe3   :  { %190 = vperm.xlu0 %256, %v181_v48   ;;  %v184_v55 = vmul.f32 %v181_v48, %v157_v52 }
  0xe4   :  { %v263_v53 = vpop.eup %262 }
  0xe5   :  { %v182_v54 = vmul.f32 %v263_v53, %v176_v43  ;;  %v186_v57 = vsub.f32 %v183_v22, %v184_v55 }
  0xe7   :  { %194 = vperm.xlu1 %257, %v182_v54   ;;  %v185_v58 = vmul.f32 %v182_v54, %v158_v56 }
  0xe9   :  { %v187_v59 = vsub.f32 %v183_v22, %v185_v58 }
  0xeb   :  { %216 = vperm.xlu1 %257, %v186_v57  }
  0xef   :  { %220 = vperm.xlu1 %257, %v187_v59  }
 0x15e   :  { %v191_v3 = vpop.permute.xlu0 %190 }
 0x15f   :  { %v202_v5 = vrot.slane %v191_v3, %v201_v2 }
 0x161   :  { %v212_v7 = vmul.f32 %v202_v5, %v335_v0 }
 0x162   :  { %v195_v4 = vpop.permute.xlu1 %194 }
 0x163   :  { %v209_v8 = vrot.slane %v195_v4, %v201_v2 }
 0x165   :  { %v213_v12 = vmul.f32 %v209_v8, %v340_v1 }
 0x166   :  { %v217_v6 = vpop.permute.xlu1 %216 }
 0x167   :  { %v228_v9 = vrot.slane %v217_v6, %v201_v2 }
 0x169   :  { %v238_v10 = vadd.f32 %v228_v9, %v212_v7 }
 0x16a   :  { %v221_v11 = vpop.permute.xlu1 %220 }
 0x16b   :  { %240 = vst [vmem:[%s401_s5] sm:$0xff] %v238_v10  ;;  %v235_v13 = vrot.slane %v221_v11, %v201_v2 }
 0x16d   :  { %v239_v14 = vadd.f32 %v235_v13, %v213_v12 }
 0x16f   :  { %241 = vst [vmem:[%s401_s5 + $0x8] sm:$0xff] %v239_v14 }
 0x170   :  { %246 = vsyncpa [#allocation3], 1 }
 0x171   :  { %247 = vsyncpa [#allocation5], 1 }

</bundles_post_ra>
